<compile_context>
chip_gen: v5e
topology: v5e:2x2
jax: 0.10.0
libtpu: 0.0.40
codegen_flags: <defaults>
</compile_context>

<pallas_src>
import functools

import jax
import jax.numpy as jnp
from jax.experimental import pallas as pl
from jax.experimental.pallas import tpu as pltpu


def _round_up(x: int, m: int) -> int:
    return ((x + m - 1) // m) * m


def _per_sample_mse_kernel(y_pred_ref, y_true_ref, out_ref, *,
                           inv_n, n_cols, tn, mask_cols):
    j = pl.program_id(1)

    @pl.when(j == 0)
    def _():
        out_ref[...] = jnp.zeros_like(out_ref)

    # Cast after load (supports bf16 inputs without f32 HBM copies); math in f32.
    p = y_pred_ref[...].astype(jnp.float32)
    t = y_true_ref[...].astype(jnp.float32)
    d = p - t
    sq = d * d
    if mask_cols:
        # Tail-column mask: out-of-range block contents are unspecified, so they
        # must be zeroed BEFORE accumulation.  All-true on non-tail tiles.
        col = j * tn + jax.lax.broadcasted_iota(jnp.int32, sq.shape, 1)
        sq = jnp.where(col < n_cols, sq, 0.0)

    # Per-step cross-lane reduce (XLU slot is free filler here) accumulated into
    # the output block, which is resident across the j axis via index_map (i, 0).
    out_ref[...] += jnp.sum(sq, axis=1, keepdims=True)

    @pl.when(j == pl.num_programs(1) - 1)
    def _():
        out_ref[...] = out_ref[...] * inv_n


def topk_mse_loss(output, label, topk: int):
    """Pallas TPU implementation of TopkMSELoss.forward."""
    assert output.shape == label.shape
    B = int(output.shape[0])
    N = 1
    for s in output.shape[1:]:
        N *= int(s)
    assert 0 < topk <= B

    # Lane-dense 2-D view: (B, T, D) -> (B, T*D).  No padding pass.
    out2d = output.reshape(B, N)
    lab2d = label.reshape(B, N)
    itemsize = jnp.dtype(output.dtype).itemsize

    # Generation-gated VMEM budget (v5e/v6e: 128 MiB physical -> 64 MiB scoped;
    # v7x: 64 MiB physical -> 32 MiB scoped).
    try:
        vmem_cap = int(pltpu.get_tpu_info().vmem_capacity_bytes)
    except Exception:  # conservative fallback if hw query is unavailable
        vmem_cap = 64 * 1024 * 1024
    vmem_limit = min(64 * 1024 * 1024, vmem_cap // 2)
    buf_budget = vmem_limit // 2            # headroom for 2 inputs x 2 buffers

    # Row tile: multiple of 8, capped at 256, and >= 2 row blocks whenever B
    # allows so v7x's two TensorCores both get work on the "parallel" axis.
    Bp = _round_up(B, 8)
    if Bp >= 16:
        TB = min(256, _round_up(max(Bp // 2, 8), 8))
    else:
        TB = Bp

    # Column tile: ~8 KiB per row per buffer (2048 cols f32 / 4096 bf16),
    # multiple of 128, clipped to the (rounded) column count and VMEM budget.
    Np = _round_up(N, 128)
    TN = min(Np, _round_up(8192 // itemsize, 128))
    max_cols = buf_budget // (4 * TB * itemsize)        # 2 inputs x 2 buffers
    TN = max(128, min(TN, (max_cols // 128) * 128))

    grid = (pl.cdiv(B, TB), pl.cdiv(N, TN))             # rows parallel, reduce last
    mask_cols = (N % TN) != 0

    kernel = functools.partial(
        _per_sample_mse_kernel,
        inv_n=1.0 / float(N), n_cols=N, tn=TN, mask_cols=mask_cols)

    per_row = pl.pallas_call(
        kernel,
        out_shape=jax.ShapeDtypeStruct((B, 1), jnp.float32),
        grid_spec=pltpu.PrefetchScalarGridSpec(
            num_scalar_prefetch=0,
            grid=grid,
            in_specs=[
                pl.BlockSpec((TB, TN), lambda i, j: (i, j)),
                pl.BlockSpec((TB, TN), lambda i, j: (i, j)),
            ],
            out_specs=pl.BlockSpec((TB, 1), lambda i, j: (i, 0)),
        ),
        compiler_params=pltpu.CompilerParams(
            dimension_semantics=("parallel", "arbitrary"),
            vmem_limit_bytes=vmem_limit,
        ),
        cost_estimate=pl.CostEstimate(
            flops=3 * B * N,
            transcendentals=0,
            bytes_accessed=2 * B * N * itemsize + 4 * B,
        ),
    )(out2d, lab2d)

    losses = per_row[:, 0]
    # TODO(synk): torch.topk has no Mosaic lowering (no in-kernel sort/top-k);
    # select the k largest of the tiny (B,) vector with jax.lax.top_k instead.
    return jax.lax.top_k(losses, topk)[0]                # sorted descending


def _topk_mse_loss_ref(output, label, topk):
    losses = jnp.mean((output - label) ** 2, axis=2)
    losses = jnp.mean(losses, axis=1)
    return jax.lax.top_k(losses, topk)[0]


if __name__ == "__main__":
    key = jax.random.PRNGKey(0)
    k1, k2 = jax.random.split(key, 2)

    # (batch, seq_len, feature) — intentionally not tile-aligned to exercise the
    # cdiv grid + in-kernel tail masking (N = 140, B = 10).
    B, T, D = 10, 20, 7
    topk = 4
    output = jax.random.normal(k1, (B, T, D), dtype=jnp.float32)
    label = jax.random.normal(k2, (B, T, D), dtype=jnp.float32)

    got = jax.block_until_ready(topk_mse_loss(output, label, topk))
    ref = jax.block_until_ready(_topk_mse_loss_ref(output, label, topk))

    assert got.shape == (topk,), (got.shape, topk)
    assert jnp.allclose(got, ref, rtol=1e-5, atol=1e-6), (got, ref)
    print("KERNEL_OK")
</pallas_src>

<mosaic_0001>
module attributes {stable_mosaic.version = 11 : i64} {
  func.func @_per_sample_mse_kernel(%arg0: i32, %arg1: i32, %arg2: memref<8x256xf32, #tpu.memory_space<vmem>>, %arg3: memref<8x256xf32, #tpu.memory_space<vmem>>, %arg4: memref<8x1xf32, #tpu.memory_space<vmem>>) attributes {dimension_semantics = [#tpu.dimension_semantics<parallel>, #tpu.dimension_semantics<arbitrary>], iteration_bounds = array<i64: 2, 1>, scalar_prefetch = 0 : i64, scratch_operands = 0 : i64, tpu.core_type = #tpu.core_type<tc>, window_params = [{transform_indices = @transform_0, window_bounds = array<i64: 8, 256>}, {transform_indices = @transform_1, window_bounds = array<i64: 8, 256>}, {transform_indices = @transform_2, window_bounds = array<i64: 8, 1>}]} {
    %c0_i32 = arith.constant 0 : i32
    %0 = arith.cmpi eq, %arg1, %c0_i32 : i32
    %1 = arith.extui %0 : i1 to i32
    %c0_i32_0 = arith.constant 0 : i32
    %2 = arith.cmpi ne, %1, %c0_i32_0 : i32
    scf.if %2 {
      %cst_11 = arith.constant 0.000000e+00 : f32
      %23 = vector.broadcast %cst_11 : f32 to vector<8x1xf32>
      %c0_12 = arith.constant 0 : index
      %c0_13 = arith.constant 0 : index
      %24 = vector.load %arg4[%c0_12, %c0_13] : memref<8x1xf32, #tpu.memory_space<vmem>>, vector<8x1xf32>
      tpu.vector_store %arg4[%c0_12, %c0_13], %23 {strides = array<i32>} : memref<8x1xf32, #tpu.memory_space<vmem>>, vector<8x1xf32>,
    } else {
    }
    %c0 = arith.constant 0 : index
    %c0_1 = arith.constant 0 : index
    %3 = vector.load %arg2[%c0, %c0_1] : memref<8x256xf32, #tpu.memory_space<vmem>>, vector<8x256xf32>
    %c0_2 = arith.constant 0 : index
    %c0_3 = arith.constant 0 : index
    %4 = vector.load %arg3[%c0_2, %c0_3] : memref<8x256xf32, #tpu.memory_space<vmem>>, vector<8x256xf32>
    %5 = arith.subf %3, %4 : vector<8x256xf32>
    %6 = arith.mulf %5, %5 : vector<8x256xf32>
    %c256_i32 = arith.constant 256 : i32
    %7 = arith.muli %arg1, %c256_i32 : i32
    %8 = tpu.iota {dimensions = array<i32: 1>} : vector<8x256xi32>
    %9 = vector.broadcast %7 : i32 to vector<8x256xi32>
    %10 = arith.addi %9, %8 : vector<8x256xi32>
    %c140_i32 = arith.constant 140 : i32
    %11 = vector.broadcast %c140_i32 : i32 to vector<8x256xi32>
    %12 = arith.cmpi slt, %10, %11 : vector<8x256xi32>
    %cst = arith.constant 0.000000e+00 : f32
    %13 = vector.broadcast %cst : f32 to vector<8x256xf32>
    %14 = arith.select %12, %6, %13 : vector<8x256xi1>, vector<8x256xf32>
    %c0_4 = arith.constant 0 : index
    %c0_5 = arith.constant 0 : index
    %15 = vector.load %arg4[%c0_4, %c0_5] : memref<8x1xf32, #tpu.memory_space<vmem>>, vector<8x1xf32>
    %cst_6 = arith.constant dense<0.000000e+00> : vector<8xf32>
    %16 = vector.multi_reduction <add>, %14, %cst_6 [1] : vector<8x256xf32> to vector<8xf32>
    %17 = vector.shape_cast %16 : vector<8xf32> to vector<8x1xf32>
    %18 = arith.addf %15, %17 : vector<8x1xf32>
    %c0_7 = arith.constant 0 : index
    %c0_8 = arith.constant 0 : index
    %19 = vector.load %arg4[%c0_7, %c0_8] : memref<8x1xf32, #tpu.memory_space<vmem>>, vector<8x1xf32>
    tpu.vector_store %arg4[%c0_7, %c0_8], %18 {strides = array<i32>} : memref<8x1xf32, #tpu.memory_space<vmem>>, vector<8x1xf32>,
    %c0_i32_9 = arith.constant 0 : i32
    %20 = arith.cmpi eq, %arg1, %c0_i32_9 : i32
    %21 = arith.extui %20 : i1 to i32
    %c0_i32_10 = arith.constant 0 : i32
    %22 = arith.cmpi ne, %21, %c0_i32_10 : i32
    scf.if %22 {
      %c0_11 = arith.constant 0 : index
      %c0_12 = arith.constant 0 : index
      %23 = vector.load %arg4[%c0_11, %c0_12] : memref<8x1xf32, #tpu.memory_space<vmem>>, vector<8x1xf32>
      %cst_13 = arith.constant 0.00714285718 : f32
      %24 = vector.broadcast %cst_13 : f32 to vector<8x1xf32>
      %25 = arith.mulf %23, %24 : vector<8x1xf32>
      %c0_14 = arith.constant 0 : index
      %c0_15 = arith.constant 0 : index
      %26 = vector.load %arg4[%c0_14, %c0_15] : memref<8x1xf32, #tpu.memory_space<vmem>>, vector<8x1xf32>
      tpu.vector_store %arg4[%c0_14, %c0_15], %25 {strides = array<i32>} : memref<8x1xf32, #tpu.memory_space<vmem>>, vector<8x1xf32>,
    } else {
    }
    return
  }
  func.func @transform_0(%arg0: i32, %arg1: i32) -> (i32, i32) {
    %c0_i32 = arith.constant 0 : i32
    return %arg0, %arg1 : i32, i32
  }
  func.func @transform_1(%arg0: i32, %arg1: i32) -> (i32, i32) {
    %c0_i32 = arith.constant 0 : i32
    return %arg0, %arg1 : i32, i32
  }
  func.func @transform_2(%arg0: i32, %arg1: i32) -> (i32, i32) {
    %c0_i32 = arith.constant 0 : i32
    %c0_i32_0 = arith.constant 0 : i32
    return %arg0, %c0_i32 : i32, i32
  }
}

</mosaic_0001>

<bundles_post_ra>
// kernel: tpu_custom_call.1
= control target key start
LH: loop header
LB: loop body
LE: loop exit
PB: predicated region body
PF: predicated region fallthrough
CT: control target
= control target key end

     0   :  { %7 = vsyncpa [#allocation3], 0  ;;  %s673_s0 = inlined_call_operand.hbm [shape: f32[10,140], index: 0, kind: input, shape index: {}]   ;;  %s674_s1 = inlined_call_operand.hbm [shape: f32[10,140], index: 1, kind: input, shape index: {}]   ;;  %s675_s2 = inlined_call_operand.vmem [shape: f32[10,1], index: 2, kind: output, shape index: {}]  }
   0x1   :  { %9 = vsyncpa [#allocation3 + $0x1], 0 }
   0x2   :  { %10 = vsyncpa [#allocation5], 0 }
   0x3   :  { %12 = vsyncpa [#allocation5 + $0x1], 0  ;;  %s575_s9 = smov 0   ;;  %s577_s10 = smov 0  }
   0x4   :  { %s579_s11 = smov 0   ;;  %s581_s12 = smov 0  }
   0x5   :  { %s583_s13 = smov 0   ;;  %s585_s14 = smov 0  }
   0x6 LB: > { %s364_s15 = sadd.s32 4294967295, %s557_s14   ;;  %s30_s16 = sadd.s32 1, %s553_s13  ;;  %s557_s14 = sphi %s585_s14, %s18_s14   ;;  %s553_s13 = sphi %s583_s13, %s682_s13   ;;  %s549_s12 = sphi %s581_s12, %s681_s12   ;;  %s545_s11 = sphi %s579_s11, %s680_s11   ;;  %s541_s10 = sphi %s577_s10, %s679_s10   ;;  %s537_s9 = sphi %s575_s9, %s678_s9  }
   0x7   : > { %p32_p0 = scmp.ge.s32.totalorder %s30_s16, 2  ;;  %s39_s17 = sadd.s32 1, %s545_s11 }
   0x8   : > { %p46_p1 = scmp.ne.s32.totalorder %s545_s11, %s541_s10  ;;  %p47_p2 = scmp.eq.s32.totalorder %s557_s14, 0 }
   0x9   : > { %s684_s16 = smov (%p32_p0, %s30_s16), 0  ;;  %p52_p4 = scmp.ne.s32.totalorder %s541_s10, %s537_s9 }
   0xa   : > { %p611_p3 = por %p47_p2, %p46_p1  ;;  %s34_s19 = ssub.s32 %s553_s13, %s684_s16 }
   0xb   : > { %p53_p5 = scmp.eq.s32.totalorder %s364_s15, 0  ;;  %p37_p6 = scmp.eq.s32.totalorder %s34_s19, 0 }
   0xc   : > { %p393_p8 = scmp.lt.s32.totalorder %s557_s14, 2  ;;  %s130_s22 = sand.u32 1, %s545_s11  }
   0xd   : > { %p618_p7 = por %p53_p5, %p52_p4  ;;  %s380_s23 = sshll.u32 %s553_s13, 4 }
   0xe   : > { %s624_s21 = scalar_select %p37_p6, %s545_s11, %s39_s17  }
   0xf   : > { %s368_s24 = sshll.u32 %s130_s22, 4  ;;  %s141_s27 = scalar_lea.hbm %s673_s0, %s380_s23 }
  0x10   : > { %s143_s28 = sshll.u32 %s141_s27, 4  ;;  %s134_s29 = scalar_lea.vmem [#allocation2], %s368_s24  ;;  %s144_s28 = int_to_ptr.hbm [resolvable:$true] %s143_s28 }
  0x11   : > { %s145_s30 = sshll.u32 %s134_s29, 4  ;;  %p387_p9 = pnand %p393_p8, %p611_p3  ;;  %s146_s30 = int_to_ptr.vmem [resolvable:$true] %s145_s30 }
  0x12   : > { %p374_p10 = scmp.ge.s32.totalorder %s557_s14, 1  ;;  %p172_p11 = scmp.lt.s32.totalorder %s557_s14, 3 }
  0x13   : > { %s131_s3 = scalar_lea.sflag [#allocation3], %s130_s22  ;;  %s163_s6 = scalar_lea.hbm %s674_s1, %s380_s23 }
  0x14   : > { %389 = dma.hbm_to_vmem [thread:$0]  (!%p387_p9), %s144_s28, 256, %s146_s30, %s131_s3  }
  0x15   : > { %p173_p12 = pnand %p374_p10, %p172_p11  ;;  %s165_s7 = sshll.u32 %s163_s6, 4  ;;  %s166_s7 = int_to_ptr.hbm [resolvable:$true] %s165_s7 }
  0x16   : > { %s156_s8 = scalar_lea.vmem [#allocation4], %s368_s24  ;;  %s153_s15 = scalar_lea.sflag [#allocation5], %s130_s22 }
  0x17   : > { %s167_s9 = sshll.u32 %s156_s8, 4  ;;  %176 = sbr.rel (%p173_p12) target bundleno = 170 (0xaa), region = 28  ;;  %s168_s9 = int_to_ptr.vmem [resolvable:$true] %s167_s9 }
  0x18   : > { %392 = dma.hbm_to_vmem [thread:$0]  (!%p387_p9), %s166_s7, 256, %s168_s9, %s153_s15  }
  0x19   : > { %s178_s17 = sand.u32 (!%p173_p12), 1, %s541_s10  }
  0x1a   : > { %s375_s18 = sshll.u32 (!%p173_p12), %s178_s17, 4  ;;  %s179_s19 = scalar_lea.sflag (!%p173_p12), [#allocation3], %s178_s17 }
  0x1b   : > { %s182_s25 = scalar_lea.vmem (!%p173_p12), [#allocation2], %s375_s18 }
  0x1c   : > { %528 = dma.done.wait (%p618_p7), %s179_s19, 256  }
  0x1d   : > { %530 = vsyncadd (%p618_p7), %s179_s19, 4294967040  ;;  %s189_s23 = scalar_lea.sflag [#allocation5], %s178_s17  ;;  %s192_s24 = scalar_lea.vmem [#allocation4], %s375_s18 }
  0x1e   : > { %532 = dma.done.wait (%p618_p7), %s189_s23, 256  }
  0x1f   : > { %534 = vsyncadd (%p618_p7), %s189_s23, 4294967040  ;;  %v239_v0 = vlaneseq  ;;  %p220_p13 = scmp.lt.s32.totalorder %s549_s12, 1  ;;  %vm228_vm0 = vcmask 7168   ;;  %v559_v3 = vmov 0.0   ;;  %v230_v4 = vld [vmem:[%s182_s25] sm:$0xff]  ;;  %v231_v5 = vld [vmem:[%s182_s25 + $0x8] sm:$0xff] }
  0x20   : > { %v232_v6 = vld [vmem:[%s192_s24] sm:$0xff]  ;;  %v233_v7 = vld [vmem:[%s192_s24 + $0x8] sm:$0xff] }
  0x21   : > { %v240_v1 = vand.u32 127, %v239_v0  ;;  %s686_s12 = smov (!%p220_p13, %s549_s12), 1  ;;  %v234_v8 = vsub.f32 %v230_v4, %v232_v6  ;;  %v235_v9 = vsub.f32 %v231_v5, %v233_v7 }
  0x22   : > { %s377_s22 = sshll.u32 %s686_s12, 3 }
  0x23   : > { %s223_s28 = scalar_lea.vmem %s675_s2, %s377_s22  ;;  %v241_v2 = vadd.s32 128, %v240_v1  ;;  %v236_v10 = vmul.f32 %v234_v8, %v234_v8  ;;  %v237_v11 = vmul.f32 %v235_v9, %v235_v9 }
  0x24   : > { %229 = vst.msk [vmem:[%s223_s28] sm:$0xff] %vm228_vm0, %v559_v3 }
  0x25   : > { %vm246_vm1 = vcmp.lt.s32.totalorder %v241_v2, 140 }
  0x26   : > { %v248_v12 = vsel %vm246_vm1, %v237_v11, 0.0 }
  0x27   : > { %v250_v13 = vadd.f32 %v248_v12, %v236_v10 }
  0x29   : > { %251 = vadd.xlane.f32.xlu0 %v250_v13 }
  0x2b   : > { %v249_v14 = vld [vmem:[%s223_s28] sm:$0xff] }
  0x9c   : > { %v252_v15 = vpop.xlane.xlu0 %251 }
  0x9d   : > { %v253_v16 = vadd.f32 %v252_v15, %v249_v14 }
  0x9f   : > { %255 = vst.msk [vmem:[%s223_s28] sm:$0xff] %vm228_vm0, %v253_v16 }
  0xa6   : > { %v259_v17 = vld [vmem:[%s223_s28] sm:$0xff] }
  0xa7   : > { %v260_v18 = vmul.f32 0.007142857, %v259_v17 }
  0xa9   : > { %261 = vst.msk [vmem:[%s223_s28] sm:$0xff] %vm228_vm0, %v260_v18 }
  0xaa PF: > { %s18_s14 = sadd.s32 1, %s557_s14   ;;  %s678_s9 = smov %s541_s10 }
  0xab   : > { %p15_p0 = scmp.ge.s32.totalorder %s18_s14, 4   ;;  %s679_s10 = smov %s545_s11 }
  0xac   : > { %s680_s11 = smov %s624_s21  ;;  %s681_s12 = smov %s553_s13 }
  0xad   : > { %s682_s13 = smov %s684_s16  ;;  %17 = sbr.rel (!%p15_p0) target bundleno = 6 (0x6), region = 89 }
  0xb2   :  { %281 = vsyncpa [#allocation3], 1 }
  0xb3   :  { %283 = vsyncpa [#allocation3 + $0x1], 1 }
  0xb4   :  { %284 = vsyncpa [#allocation5], 1 }
  0xb5   :  { %286 = vsyncpa [#allocation5 + $0x1], 1 }

</bundles_post_ra>
